<compile_context>
chip_gen: v6e
topology: v6e:2x2x1
jax: 0.10.0
libtpu: 0.0.40
codegen_flags: <defaults>
</compile_context>

<pallas_src>
import functools

import numpy as np
import jax
import jax.numpy as jnp
from jax.experimental import pallas as pl
from jax.experimental.pallas import tpu as pltpu


def _round_up(x: int, n: int) -> int:
    return ((x + n - 1) // n) * n


# ----------------------------------------------------------------------------
# Pallas kernel: fused Legendre basis + Khatri-Rao features + single matmul
# ----------------------------------------------------------------------------
def hcr_layer_kernel(x_ref, coef_ref, out_ref, *, input_dim, m):
    """x_ref   : (TB, input_dim)                float32 batch tile
       coef_ref: ((m+1)**input_dim, O_pad)      float32, row 0 zeroed, lane-padded
       out_ref : (TB, O_pad)                    float32 (lane-dense store)
    """
    x = x_ref[...]                                    # (TB, input_dim)
    t = 2.0 * x - 1.0

    # Legendre recurrence for all input dims at once (cheap VPU work that hides
    # under the DMA/MXU slack): P_0 = 1, P_1 = t, (j+1)P_{j+1} = (2j+1)tP_j - jP_{j-1}
    polys = [jnp.ones_like(t)]
    if m >= 1:
        polys.append(t)
    for j in range(1, m):
        polys.append(((2.0 * j + 1.0) * t * polys[j] - float(j) * polys[j - 1])
                     / float(j + 1))
    # Orthonormal rescale rho_j = sqrt(2j+1) * P_j(2x-1); each is (TB, input_dim).
    rhos = [float(np.sqrt(2.0 * j + 1.0)) * polys[j] for j in range(m + 1)]

    # Per-input-dimension basis matrices  B_i : (TB, m+1)
    Bs = [jnp.concatenate([rhos[j][:, i:i + 1] for j in range(m + 1)], axis=-1)
          for i in range(input_dim)]

    # Row-wise Khatri-Rao feature matrix F : (TB, (m+1)**input_dim) with columns
    # in C order, i.e. F[:, flat(idx)] = prod_i rho_{idx_i}(x[:, i]).
    F = Bs[0]
    for i in range(1, input_dim):
        ncol = F.shape[1]
        F = jnp.concatenate([F[:, a:a + 1] * Bs[i] for a in range(ncol)],
                            axis=-1)
    # TODO(synk): for large (m+1)**(input_dim-1) this unrolled construction
    #             should become a gridded / fori_loop Khatri-Rao to bound
    #             code size and vreg live ranges.

    # Single MXU matmul against the coefficient table (its all-zero-index row
    # is zeroed in the glue, so "1 +" reproduces the reference's skip of idx=0).
    out_ref[...] = 1.0 + jnp.dot(F, coef_ref[...],
                                 preferred_element_type=jnp.float32)


# ----------------------------------------------------------------------------
# Glue: one HCRLayer forward
# ----------------------------------------------------------------------------
def _prepare_coefficients(coefficients, output_dim, o_pad):
    """(O, K) -> (K, O_pad), row 0 zeroed, lane-padded.

    NOTE: if `coefficients` are static parameters this prep can be done once
    and cached instead of per forward call.
    """
    coef = jnp.asarray(coefficients, jnp.float32).T          # (K, O)
    coef = coef.at[0, :].set(0.0)
    return jnp.pad(coef, ((0, 0), (0, o_pad - output_dim)))  # (K, O_pad)


def hcr_layer_forward(x, coefficients, *, m, block_batch=512):
    """HCRLayer.forward: basis + hcr_density, fully inside one Pallas kernel."""
    x = jnp.asarray(x, jnp.float32)
    batch, input_dim = x.shape
    output_dim = coefficients.shape[0]
    K = (m + 1) ** input_dim
    assert coefficients.shape == (output_dim, K)

    # Lane-dense output: pad output_dim up to a multiple of 128 (sliced after).
    o_pad = _round_up(output_dim, 128)
    coef = _prepare_coefficients(coefficients, output_dim, o_pad)

    # Batch tiling: TB multiple of 8 (sublane rule); pad batch to a TB multiple.
    tb = block_batch if batch >= block_batch else _round_up(batch, 8)
    padded_batch = _round_up(batch, tb)
    if padded_batch != batch:
        x = jnp.pad(x, ((0, padded_batch - batch), (0, 0)))
    grid = (padded_batch // tb,)

    kernel = functools.partial(hcr_layer_kernel, input_dim=input_dim, m=m)
    out = pl.pallas_call(
        kernel,
        out_shape=jax.ShapeDtypeStruct((padded_batch, o_pad), jnp.float32),
        grid=grid,
        in_specs=[
            pl.BlockSpec((tb, input_dim), lambda i: (i, 0)),   # x batch tile
            pl.BlockSpec((K, o_pad), lambda i: (0, 0)),        # resident coef
        ],
        out_specs=pl.BlockSpec((tb, o_pad), lambda i: (i, 0)),
        compiler_params=pltpu.CompilerParams(
            dimension_semantics=("parallel",),   # shard batch tiles across TCs (v7x)
        ),
    )(x, coef)
    return out[:batch, :output_dim]


def hcrnn_forward(x, coefficients_list, *, m):
    """HCRNN.forward: chain of HCRLayer Pallas kernels."""
    for coef in coefficients_list:
        x = hcr_layer_forward(x, coef, m=m)
    return x


# ----------------------------------------------------------------------------
# Pure-numpy (float64) reference — direct transcription of HCRLayer.hcr_density
# ----------------------------------------------------------------------------
def _legendre_basis_np(xcol, m):
    t = 2.0 * xcol - 1.0
    polys = [np.ones_like(t)]
    if m >= 1:
        polys.append(t)
    for j in range(1, m):
        polys.append(((2 * j + 1) * t * polys[j] - j * polys[j - 1]) / (j + 1))
    return np.stack([np.sqrt(2.0 * j + 1.0) * polys[j] for j in range(m + 1)],
                    axis=-1)


def hcr_layer_reference(x, coefficients, *, m):
    x = np.asarray(x, np.float64)
    coefficients = np.asarray(coefficients, np.float64)
    batch, input_dim = x.shape
    output_dim = coefficients.shape[0]
    basis = np.stack([_legendre_basis_np(x[:, i], m) for i in range(input_dim)],
                     axis=1)                                   # (batch, d, m+1)
    density = np.ones((batch, output_dim), dtype=np.float64)
    for idx in np.ndindex(*([m + 1] * input_dim)):
        if sum(idx) > 0:
            flat = np.ravel_multi_index(idx, (m + 1,) * input_dim)
            cs = coefficients[:, flat]
            bs = np.prod(basis[:, range(input_dim), idx], axis=1)
            density += cs[None, :] * bs[:, None]
    return density


if __name__ == "__main__":
    key = jax.random.PRNGKey(0)
    k1, k2, k3 = jax.random.split(key, 3)

    # --- single HCRLayer, full-scale coefficients (tight check) -------------
    batch, input_dim, output_dim, m = 8, 2, 4, 3
    x = jax.random.uniform(k1, (batch, input_dim), dtype=jnp.float32)  # HCR domain [0,1]
    coef0 = jax.random.normal(
        k2, (output_dim, (m + 1) ** input_dim), dtype=jnp.float32)     # torch.randn shape

    out1 = jax.block_until_ready(hcr_layer_forward(x, coef0, m=m))
    ref1 = hcr_layer_reference(np.asarray(x), np.asarray(coef0), m=m)
    np.testing.assert_allclose(np.asarray(out1), ref1, rtol=1e-5, atol=1e-4)

    # --- HCRNN stack: layer_dims = [2, 3, 4]  (the HCR branch of HCRKAN) ----
    layer_dims = [2, 3, 4]
    coefs = []
    kk = k3
    for li in range(len(layer_dims) - 1):
        kk, sub = jax.random.split(kk)
        coefs.append(0.01 * jax.random.normal(
            sub, (layer_dims[li + 1], (m + 1) ** layer_dims[li]),
            dtype=jnp.float32))

    out2 = jax.block_until_ready(hcrnn_forward(x, coefs, m=m))
    ref2 = np.asarray(x, np.float64)
    for c in coefs:
        ref2 = hcr_layer_reference(ref2, np.asarray(c), m=m)
    np.testing.assert_allclose(np.asarray(out2), ref2, rtol=5e-3, atol=0.5)
    assert np.all(np.isfinite(np.asarray(out2)))

    print("KERNEL_OK")
</pallas_src>

<mosaic_0001>
module attributes {stable_mosaic.version = 11 : i64} {
  func.func @hcr_layer_kernel(%arg0: i32, %arg1: memref<8x2xf32, #tpu.memory_space<vmem>>, %arg2: memref<16x128xf32, #tpu.memory_space<vmem>>, %arg3: memref<8x128xf32, #tpu.memory_space<vmem>>) attributes {dimension_semantics = [#tpu.dimension_semantics<parallel>], iteration_bounds = array<i64: 1>, scalar_prefetch = 0 : i64, scratch_operands = 0 : i64, tpu.core_type = #tpu.core_type<tc>, window_params = [{transform_indices = @transform_0, window_bounds = array<i64: 8, 2>}, {pipeline_mode = #tpu.pipeline_mode<synchronous>, transform_indices = @transform_1, window_bounds = array<i64: 16, 128>}, {transform_indices = @transform_2, window_bounds = array<i64: 8, 128>}]} {
    %c0 = arith.constant 0 : index
    %c0_0 = arith.constant 0 : index
    %0 = vector.load %arg1[%c0, %c0_0] : memref<8x2xf32, #tpu.memory_space<vmem>>, vector<8x2xf32>
    %cst = arith.constant 2.000000e+00 : f32
    %1 = vector.broadcast %cst : f32 to vector<8x2xf32>
    %2 = arith.mulf %1, %0 : vector<8x2xf32>
    %cst_1 = arith.constant 1.000000e+00 : f32
    %3 = vector.broadcast %cst_1 : f32 to vector<8x2xf32>
    %4 = arith.subf %2, %3 : vector<8x2xf32>
    %cst_2 = arith.constant 1.000000e+00 : f32
    %5 = vector.broadcast %cst_2 : f32 to vector<8x2xf32>
    %cst_3 = arith.constant 3.000000e+00 : f32
    %6 = vector.broadcast %cst_3 : f32 to vector<8x2xf32>
    %7 = arith.mulf %6, %4 : vector<8x2xf32>
    %8 = arith.mulf %7, %4 : vector<8x2xf32>
    %cst_4 = arith.constant 1.000000e+00 : f32
    %9 = vector.broadcast %cst_4 : f32 to vector<8x2xf32>
    %10 = arith.mulf %9, %5 : vector<8x2xf32>
    %11 = arith.subf %8, %10 : vector<8x2xf32>
    %cst_5 = arith.constant 2.000000e+00 : f32
    %12 = vector.broadcast %cst_5 : f32 to vector<8x2xf32>
    %13 = arith.divf %11, %12 : vector<8x2xf32>
    %cst_6 = arith.constant 5.000000e+00 : f32
    %14 = vector.broadcast %cst_6 : f32 to vector<8x2xf32>
    %15 = arith.mulf %14, %4 : vector<8x2xf32>
    %16 = arith.mulf %15, %13 : vector<8x2xf32>
    %cst_7 = arith.constant 2.000000e+00 : f32
    %17 = vector.broadcast %cst_7 : f32 to vector<8x2xf32>
    %18 = arith.mulf %17, %4 : vector<8x2xf32>
    %19 = arith.subf %16, %18 : vector<8x2xf32>
    %cst_8 = arith.constant 3.000000e+00 : f32
    %20 = vector.broadcast %cst_8 : f32 to vector<8x2xf32>
    %21 = arith.divf %19, %20 : vector<8x2xf32>
    %cst_9 = arith.constant 1.000000e+00 : f32
    %22 = vector.broadcast %cst_9 : f32 to vector<8x2xf32>
    %23 = arith.mulf %22, %5 : vector<8x2xf32>
    %cst_10 = arith.constant 1.73205078 : f32
    %24 = vector.broadcast %cst_10 : f32 to vector<8x2xf32>
    %25 = arith.mulf %24, %4 : vector<8x2xf32>
    %cst_11 = arith.constant 2.23606801 : f32
    %26 = vector.broadcast %cst_11 : f32 to vector<8x2xf32>
    %27 = arith.mulf %26, %13 : vector<8x2xf32>
    %cst_12 = arith.constant 2.64575124 : f32
    %28 = vector.broadcast %cst_12 : f32 to vector<8x2xf32>
    %29 = arith.mulf %28, %21 : vector<8x2xf32>
    %30 = vector.extract_strided_slice %23 {offsets = [0, 0], sizes = [8, 1], strides = [1, 1]} : vector<8x2xf32> to vector<8x1xf32>
    %31 = vector.extract_strided_slice %25 {offsets = [0, 0], sizes = [8, 1], strides = [1, 1]} : vector<8x2xf32> to vector<8x1xf32>
    %32 = vector.extract_strided_slice %27 {offsets = [0, 0], sizes = [8, 1], strides = [1, 1]} : vector<8x2xf32> to vector<8x1xf32>
    %33 = vector.extract_strided_slice %29 {offsets = [0, 0], sizes = [8, 1], strides = [1, 1]} : vector<8x2xf32> to vector<8x1xf32>
    %34 = tpu.concatenate %30, %31, %32, %33 in 1 : vector<8x1xf32>, vector<8x1xf32>, vector<8x1xf32>, vector<8x1xf32> -> vector<8x4xf32>
    %35 = vector.extract_strided_slice %23 {offsets = [0, 1], sizes = [8, 1], strides = [1, 1]} : vector<8x2xf32> to vector<8x1xf32>
    %36 = vector.extract_strided_slice %25 {offsets = [0, 1], sizes = [8, 1], strides = [1, 1]} : vector<8x2xf32> to vector<8x1xf32>
    %37 = vector.extract_strided_slice %27 {offsets = [0, 1], sizes = [8, 1], strides = [1, 1]} : vector<8x2xf32> to vector<8x1xf32>
    %38 = vector.extract_strided_slice %29 {offsets = [0, 1], sizes = [8, 1], strides = [1, 1]} : vector<8x2xf32> to vector<8x1xf32>
    %39 = tpu.concatenate %35, %36, %37, %38 in 1 : vector<8x1xf32>, vector<8x1xf32>, vector<8x1xf32>, vector<8x1xf32> -> vector<8x4xf32>
    %40 = vector.extract_strided_slice %34 {offsets = [0, 0], sizes = [8, 1], strides = [1, 1]} : vector<8x4xf32> to vector<8x1xf32>
    %41 = vector.broadcast %40 : vector<8x1xf32> to vector<8x4xf32>
    %42 = arith.mulf %41, %39 : vector<8x4xf32>
    %43 = vector.extract_strided_slice %34 {offsets = [0, 1], sizes = [8, 1], strides = [1, 1]} : vector<8x4xf32> to vector<8x1xf32>
    %44 = vector.broadcast %43 : vector<8x1xf32> to vector<8x4xf32>
    %45 = arith.mulf %44, %39 : vector<8x4xf32>
    %46 = vector.extract_strided_slice %34 {offsets = [0, 2], sizes = [8, 1], strides = [1, 1]} : vector<8x4xf32> to vector<8x1xf32>
    %47 = vector.broadcast %46 : vector<8x1xf32> to vector<8x4xf32>
    %48 = arith.mulf %47, %39 : vector<8x4xf32>
    %49 = vector.extract_strided_slice %34 {offsets = [0, 3], sizes = [8, 1], strides = [1, 1]} : vector<8x4xf32> to vector<8x1xf32>
    %50 = vector.broadcast %49 : vector<8x1xf32> to vector<8x4xf32>
    %51 = arith.mulf %50, %39 : vector<8x4xf32>
    %52 = tpu.concatenate %42, %45, %48, %51 in 1 : vector<8x4xf32>, vector<8x4xf32>, vector<8x4xf32>, vector<8x4xf32> -> vector<8x16xf32>
    %c0_13 = arith.constant 0 : index
    %c0_14 = arith.constant 0 : index
    %53 = vector.load %arg2[%c0_13, %c0_14] : memref<16x128xf32, #tpu.memory_space<vmem>>, vector<16x128xf32>
    %cst_15 = arith.constant dense<0.000000e+00> : vector<8x128xf32>
    %54 = tpu.matmul %52, %53, %cst_15 {dimension_numbers = #tpu.dot_dimension_numbers<[1], [0], [0], [1], [0, 0, 1, 1], [], []>} : vector<8x16xf32>, vector<16x128xf32>, vector<8x128xf32> -> vector<8x128xf32>
    %cst_16 = arith.constant 1.000000e+00 : f32
    %55 = vector.broadcast %cst_16 : f32 to vector<8x128xf32>
    %56 = arith.addf %55, %54 : vector<8x128xf32>
    %c0_17 = arith.constant 0 : index
    %c0_18 = arith.constant 0 : index
    %57 = vector.load %arg3[%c0_17, %c0_18] : memref<8x128xf32, #tpu.memory_space<vmem>>, vector<8x128xf32>
    tpu.vector_store %arg3[%c0_17, %c0_18], %56 {strides = array<i32>} : memref<8x128xf32, #tpu.memory_space<vmem>>, vector<8x128xf32>,
    return
  }
  func.func @transform_0(%arg0: i32) -> (i32, i32) {
    %c0_i32 = arith.constant 0 : i32
    %c0_i32_0 = arith.constant 0 : i32
    return %arg0, %c0_i32 : i32, i32
  }
  func.func @transform_1(%arg0: i32) -> (i32, i32) {
    %c0_i32 = arith.constant 0 : i32
    %c0_i32_0 = arith.constant 0 : i32
    %c0_i32_1 = arith.constant 0 : i32
    return %c0_i32, %c0_i32_0 : i32, i32
  }
  func.func @transform_2(%arg0: i32) -> (i32, i32) {
    %c0_i32 = arith.constant 0 : i32
    %c0_i32_0 = arith.constant 0 : i32
    return %arg0, %c0_i32 : i32, i32
  }
}

</mosaic_0001>

<bundles_post_ra>
// kernel: tpu_custom_call.1
= control target key start
LH: loop header
LB: loop body
LE: loop exit
PB: predicated region body
PF: predicated region fallthrough
CT: control target
= control target key end

     0   :  { %7 = vsyncpa [#allocation3], 0  ;;  %s327_s0 = inlined_call_operand.vmem [shape: f32[8,2], index: 0, kind: input, shape index: {}]   ;;  %s328_s1 = inlined_call_operand.hbm [shape: f32[16,128], index: 1, kind: input, shape index: {}]   ;;  %s329_s2 = inlined_call_operand.hbm [shape: f32[8,128], index: 2, kind: output, shape index: {}]  }
   0x1   :  { %8 = vsyncpa [#allocation4], 0  ;;  %s278_s9 = smov [#allocation2]  }
   0x2   :  { %s16_s10 = sshll.u32 %s278_s9, 4  ;;  %s17_s10 = int_to_ptr.vmem [resolvable:$true] %s16_s10 }
   0x3   :  { %s242_s11 = scalar_lea.vmem %s17_s10, 256  ;;  %p247_p1 = scmp.lt.s32.totalorder %s17_s10, %s17_s10 }
   0x4   :  { %p243_p0 = scmp.ne.s32.totalorder %s17_s10, %s242_s11  ;;  %p248_p2 = scmp.lt.s32.totalorder %s242_s11, %s242_s11 }
   0x6   :  { %p249_p3 = por %p248_p2, %p247_p1 }
   0x8   :  { %p250_p4 = pnand %p249_p3, %p243_p0 }
   0xa   :  { %253 = shalt.err (!%p250_p4)
}
   0xb   :  { %s279_s12 = smov 128   ;;  %s280_s13 = smov 8  }
   0xc   :  { %22 = dma.hbm_to_vmem [thread:$0]  %s328_s1, 256, %s17_s10, [#allocation3], %s279_s12, %s279_s12, %s280_s13  }
   0xd   :  { %274 = dma.done.wait [#allocation3], 256  }
   0xe   :  { %275 = vsyncadd [#allocation3], 4294967040  ;;  %v26_v0 = vld [vmem:[%s327_s0] sm:$0xff]  ;;  %s281_s18 = smov 1   ;;  %v282_v6 = vmov 2   ;;  %v283_v7 = vmov 1  }
   0xf   :  { %v27_v1 = vmul.f32 2.0, %v26_v0  ;;  %230 = vset.pattern.permute.xlu0 %v282_v6  ;;  %229 = vset.pattern.permute.xlu1 %v283_v7  ;;  %s284_s1 = smov 2   ;;  %s285_s0 = smov 3   ;;  %vm55_vm0 = vcmask 7168   ;;  %vm57_vm1 = vcmask 15360   ;;  %vm59_vm2 = vcmask 23552  }
  0x10   :  { %v286_v23 = vmov 3   ;;  %v287_v24 = vmov 0   ;;  %v288_v26 = vmov 0.0   ;;  %v110_v27 = vld [vmem:[#allocation2 + $0x8] sm:$0xff]  ;;  %v109_v29 = vld [vmem:[#allocation2] sm:$0xff]  ;;  %vm289_vm3 = vmmov 0  }
  0x11   :  { %v201_v2 = vadd.f32 -1.0, %v27_v1  ;;  %207 = vmatprep.subr.mxu0 %v288_v26  ;;  %211 = vmatprep.mubr.msk.f32.mxu0 %vm289_vm3, %v288_v26  ;;  %s290_s19 = smov 4   ;;  %s291_s20 = smov 12   ;;  %vm103_vm4 = vcmask 31744   ;;  %vm105_vm5 = vcmask 64512   ;;  %vm107_vm6 = vcmask 97280  }
  0x12   :  { %208 = vmatpush3.msra.mxu0 %v110_v27  ;;  %vm111_vm7 = vcmask 130048   ;;  %s292_s21 = smov [#allocation5]  }
  0x13   :  { %v40_v3 = vmul.f32 1.7320508, %v201_v2  ;;  %v29_v4 = vmul.f32 3.0, %v201_v2  ;;  %v34_v9 = vmul.f32 5.0, %v201_v2  ;;  %v36_v11 = vmul.f32 2.0, %v201_v2  ;;  %209 = vmatprep.subr.mxu0 %v288_v26  ;;  %s192_s22 = sshll.u32 %s292_s21, 4  ;;  %s193_s22 = int_to_ptr.vmem [resolvable:$true] %s192_s22 }
  0x14   :  { %210 = vmatpush3.msra.mxu0 %v109_v29  ;;  %s254_s23 = scalar_lea.vmem %s193_s22, 128  ;;  %p259_p6 = scmp.lt.s32.totalorder %s193_s22, %s193_s22 }
  0x15   :  { %44 = vrot.lane.b32.xlu0 %v40_v3, %s281_s18  ;;  %v30_v5 = vmul.f32 %v201_v2, %v29_v4  ;;  %v67_v31 = vsel %vm55_vm0, 1.0, %v40_v3  ;;  %p255_p5 = scmp.ne.s32.totalorder %s193_s22, %s254_s23  ;;  %p260_p7 = scmp.lt.s32.totalorder %s254_s23, %s254_s23 }
  0x17   :  { %v202_v8 = vadd.f32 -1.0, %v30_v5  ;;  %p261_p8 = por %p260_p7, %p259_p6 }
  0x19   :  { %v33_v10 = vmul.f32 0.5, %v202_v8  ;;  %p262_p9 = pnand %p261_p8, %p255_p5 }
  0x1b   :  { %v41_v12 = vmul.f32 2.236068, %v33_v10  ;;  %v35_v13 = vmul.f32 %v34_v9, %v33_v10 }
  0x1d   :  { %48 = vrot.lane.b32.xlu0 %v41_v12, %s284_s1  ;;  %v37_v14 = vsub.f32 %v35_v13, %v36_v11 }
  0x1f   :  { %v39_v15 = vmul.f32 0.33333334, %v37_v14 }
  0x21   :  { %v42_v16 = vmul.f32 2.6457512, %v39_v15 }
  0x23   :  { %52 = vrot.lane.b32.xlu1 %v42_v16, %s285_s0 }
  0x87   :  { %v45_v17 = vpop.permute.xlu0 %44 }
  0x88   :  { %v56_v18 = vsel %vm55_vm0, 1.0, %v45_v17 }
  0x8f   :  { %v49_v19 = vpop.permute.xlu0 %48 }
  0x90   :  { %v58_v20 = vsel %vm57_vm1, %v56_v18, %v49_v19 }
  0x95   :  { %v53_v21 = vpop.permute.xlu1 %52 }
  0x96   :  { %v60_v22 = vsel %vm59_vm2, %v58_v20, %v53_v21 }
  0x97   :  { %82 = vperm.xlu0 %230, %v60_v22   ;;  %77 = vperm.xlu1 %229, %v60_v22  }
  0x9b   :  { %231 = vset.pattern.permute.xlu1 %v286_v23  ;;  %64 = vrot.lane.b32.xlu0 %v42_v16, %s284_s1 }
  0x9c   :  { %87 = vperm.xlu1 %231, %v60_v22   ;;  %233 = vset.pattern.permute.xlu0 %v286_v23 }
  0xa0   :  { %61 = vrot.lane.b32.xlu1 %v41_v12, %s281_s18 }
  0xa1   :  { %232 = vset.pattern.permute.xlu1 %v287_v24 }
  0xa4   :  { %72 = vperm.xlu1 %232, %v60_v22  }
 0x112   :  { %v78_v25 = vpop.permute.xlu1 %77  ;;  %v83_v28 = vpop.permute.xlu0 %82 }
 0x116   :  { %v65_v32 = vpop.permute.xlu0 %64 }
 0x117   :  { %v88_v30 = vpop.permute.xlu1 %87 }
 0x11b   :  { %v62_v33 = vpop.permute.xlu1 %61 }
 0x11c   :  { %v68_v34 = vsel %vm57_vm1, %v67_v31, %v62_v33 }
 0x11d   :  { %v69_v35 = vsel %vm59_vm2, %v68_v34, %v65_v32 }
 0x11e   :  { %v85_v36 = vmul.f32 %v83_v28, %v69_v35  ;;  %v80_v37 = vmul.f32 %v78_v25, %v69_v35  ;;  %v90_v38 = vmul.f32 %v88_v30, %v69_v35 }
 0x11f   :  { %v73_v39 = vpop.permute.xlu1 %72 }
 0x120   :  { %96 = vrot.lane.b32.xlu1 %v85_v36, %s280_s13  ;;  %92 = vrot.lane.b32.xlu0 %v80_v37, %s290_s19  ;;  %v75_v40 = vmul.f32 %v73_v39, %v69_v35 }
 0x124   :  { %100 = vrot.lane.b32.xlu0 %v90_v38, %s291_s20 }
 0x192   :  { %v93_v41 = vpop.permute.xlu0 %92  ;;  %v97_v43 = vpop.permute.xlu1 %96 }
 0x193   :  { %v104_v42 = vsel %vm103_vm4, %v75_v40, %v93_v41 }
 0x194   :  { %v106_v44 = vsel %vm105_vm5, %v104_v42, %v97_v43 }
 0x196   :  { %v101_v45 = vpop.permute.xlu0 %100 }
 0x197   :  { %v108_v46 = vsel %vm107_vm6, %v106_v44, %v101_v45 }
 0x198   :  { %212 = vmatmul.mubr.msk.f32.vlgmr.msra.gmra.mxu0 %vm111_vm7, %v108_v46 }
 0x258   :  { %v181_v47 = vpop.f32.mrf.mxu0 }
 0x259   :  { %v182_v48 = vadd.f32 1.0, %v181_v47 }
 0x25a   :  { %v213_v49 = vpop.f32.mrf.mxu0 }
 0x25b   :  { %185 = vst [vmem:[#allocation5] sm:$0xff] %v182_v48 }
 0x25c   :  { %265 = shalt.err (!%p262_p9)
}
 0x25d   :  { %195 = dma.vmem_to_hbm [thread:$0]  %s193_s22, 128, %s329_s2, [#allocation4]  }
 0x25e   :  { %276 = dma.done.wait [#allocation4], 128  }
 0x25f   :  { %277 = vsyncadd [#allocation4], 4294967168 }
 0x260   :  { %199 = vsyncpa [#allocation3], 1 }
 0x261   :  { %200 = vsyncpa [#allocation4], 1 }

</bundles_post_ra>
